<compile_context>
chip_gen: v7x
topology: tpu7x:2x2x1
jax: 0.10.0
libtpu: 0.0.40
codegen_flags: <defaults>
</compile_context>

<pallas_src>
import functools

import jax
import jax.numpy as jnp
from jax import lax
from jax.experimental import pallas as pl
from jax.experimental.pallas import tpu as pltpu


_LANE = 128
_CHUNK_ROWS = 64          # sublane rows per inner-loop iteration (multiple of 8)


def _round_up(x, m):
    return -(-x // m) * m


def _vmem_capacity_bytes():
    try:
        return int(pltpu.get_tpu_info().vmem_capacity_bytes)
    except Exception:
        return 64 << 20   # v7x per-TensorCore capacity (the most restrictive)


def _crossover_factor():
    # VPU MACs scale as Cin*Cout while HBM bytes scale as Cin+Cout.  Faster
    # HBM (newer gens) makes compute the ceiling sooner, so switch to the MXU
    # earlier there.
    try:
        kind = jax.devices()[0].device_kind.lower()
    except Exception:
        return 4.0
    if "v5" in kind:
        return 9.0
    if "v6" in kind:
        return 5.0
    return 3.0            # v7x and newer


def _step_byte_budget(vmem_cap):
    # ~8 MiB of (x + out) per grid step amortizes the ~0.35us/step overhead
    # (>=90% of the HBM roofline on all gens) while double-buffered VMEM stays
    # well inside v7x's 64 MiB.
    return min(8 << 20, max(2 << 20, vmem_cap // 8))


# ----------------------------------------------------------------------------
# VPU path: small channel counts, channel contraction as broadcast-MACs.
# ----------------------------------------------------------------------------
def _vpu_kernel(cin, cout, chunk_rows, w_ref, b_ref, x_ref, o_ref):
    """out[n,o,r,l] = sum_c w[o,c] * x[n,c,r,l] + b[o] on full (8,128) vregs.

    w_ref : SMEM (cout, cin) f32      b_ref : SMEM (cout,) f32
    x_ref : VMEM (n_blk, cin, t_rows, 128)
    o_ref : VMEM (n_blk, cout, t_rows, 128)
    """
    n_blk = x_ref.shape[0]
    t_rows = x_ref.shape[2]

    def mac_rows(n, r0, nrows):
        # Per-channel reads straight from the ref (simple strided vector
        # loads); the accumulator is a full (nrows, 128) tile, so every VALU
        # op and every store uses whole vregs.  One store per output channel.
        for o in range(cout):
            acc = x_ref[n, 0, pl.ds(r0, nrows), :].astype(jnp.float32) * w_ref[o, 0]
            for c in range(1, cin):
                acc = acc + x_ref[n, c, pl.ds(r0, nrows), :].astype(jnp.float32) * w_ref[o, c]
            o_ref[n, o, pl.ds(r0, nrows), :] = (acc + b_ref[o]).astype(o_ref.dtype)

    n_chunks = t_rows // chunk_rows
    rem = t_rows - n_chunks * chunk_rows
    for n in range(n_blk):                      # n_blk is small and static
        if n_chunks > 0:
            def body(i, carry, n=n):
                mac_rows(n, pl.multiple_of(i * chunk_rows, chunk_rows), chunk_rows)
                return carry
            lax.fori_loop(0, n_chunks, body, 0)
        if rem > 0:
            mac_rows(n, n_chunks * chunk_rows, rem)


def _choose_vpu_tiles(N, rows, cin, cout, itemsize, vmem_cap):
    budget = _step_byte_budget(vmem_cap)
    bytes_per_row = (cin + cout) * _LANE * itemsize
    target_steps = 4                            # >= 2 steps per v7x TensorCore
    img_bytes = rows * bytes_per_row

    if img_bytes <= budget:
        # Whole image(s) per step; batch several images when maps are small so
        # per-step bytes stay in the multi-MiB range, but keep enough grid
        # steps that both v7x TensorCores get work.
        n_blk = max(1, min(N, budget // max(1, img_bytes)))
        n_blk = min(n_blk, max(1, N // min(target_steps, N)))
        t_rows = rows
        steps = -(-N // n_blk)
        if steps < target_steps and rows >= 2 * _CHUNK_ROWS and img_bytes >= (1 << 20):
            per = -(-target_steps // steps)
            t_rows = max(_CHUNK_ROWS,
                         ((-(-rows // per)) // _CHUNK_ROWS) * _CHUNK_ROWS)
        return n_blk, t_rows

    # One image per step, tile rows; keep t_rows a multiple of the inner chunk.
    t_rows = max(_CHUNK_ROWS, (budget // bytes_per_row // _CHUNK_ROWS) * _CHUNK_ROWS)
    while N * (-(-rows // t_rows)) < target_steps and t_rows > _CHUNK_ROWS:
        t_rows = max(_CHUNK_ROWS, (t_rows // 2 // _CHUNK_ROWS) * _CHUNK_ROWS)
    return 1, min(t_rows, rows)


def _out_conv_vpu(x_nchw, w2, bias, vmem_cap):
    N, Cin, H, W = x_nchw.shape
    Cout = w2.shape[0]
    HW = H * W
    dtype = x_nchw.dtype
    itemsize = jnp.dtype(dtype).itemsize

    # Fold spatial into a trailing (rows, 128) pair.  Free view when
    # HW % 128 == 0; otherwise pad the flattened spatial axis.
    # TODO(synk): a 3-D masked-edge variant would avoid the pad copy for
    # HW % 128 != 0; padding keeps that rare case simple and correct.
    HW_pad = _round_up(HW, _LANE)
    x3 = x_nchw.reshape(N, Cin, HW)
    if HW_pad != HW:
        x3 = jnp.pad(x3, ((0, 0), (0, 0), (0, HW_pad - HW)))
    rows = HW_pad // _LANE
    x4 = x3.reshape(N, Cin, rows, _LANE)

    n_blk, t_rows = _choose_vpu_tiles(N, rows, Cin, Cout, itemsize, vmem_cap)
    grid = (pl.cdiv(N, n_blk), pl.cdiv(rows, t_rows))

    x_spec = pl.BlockSpec((n_blk, Cin, t_rows, _LANE), lambda b, j: (b, 0, j, 0))
    o_spec = pl.BlockSpec((n_blk, Cout, t_rows, _LANE), lambda b, j: (b, 0, j, 0))
    w_spec = pl.BlockSpec(memory_space=pltpu.MemorySpace.SMEM)
    b_spec = pl.BlockSpec(memory_space=pltpu.MemorySpace.SMEM)

    kernel = functools.partial(_vpu_kernel, Cin, Cout, _CHUNK_ROWS)

    # Exact block bytes (the 4-D layout has no sublane padding waste), double
    # buffered, plus slack; never pin more than (physical - 8 MiB).
    block_bytes = n_blk * (Cin + Cout) * t_rows * _LANE * itemsize
    vmem_limit = 2 * block_bytes + (4 << 20)
    vmem_limit = int(min(max(vmem_limit, 16 << 20),
                         max(32 << 20, vmem_cap - (8 << 20))))

    cost = pl.CostEstimate(
        flops=2 * N * HW * Cin * Cout,
        transcendentals=0,
        bytes_accessed=(N * Cin * HW + N * Cout * HW) * itemsize
                       + (Cin * Cout + Cout) * 4,
    )

    out4 = pl.pallas_call(
        kernel,
        out_shape=jax.ShapeDtypeStruct((N, Cout, rows, _LANE), dtype),
        grid=grid,
        in_specs=[w_spec, b_spec, x_spec],
        out_specs=o_spec,
        compiler_params=pltpu.CompilerParams(
            dimension_semantics=("parallel", "parallel"),
            vmem_limit_bytes=vmem_limit,
        ),
        cost_estimate=cost,
    )(w2.astype(jnp.float32), bias.astype(jnp.float32), x4)

    out3 = out4.reshape(N, Cout, HW_pad)
    if HW_pad != HW:
        out3 = out3[:, :, :HW]
    return out3.reshape(N, Cout, H, W)


# ----------------------------------------------------------------------------
# MXU path: larger channel counts, channel contraction as a matmul.
# ----------------------------------------------------------------------------
def _mxu_kernel(w_ref, b_ref, x_ref, o_ref):
    # w_ref: VMEM (Cout, Cin) in activation dtype   b_ref: VMEM (Cout, 1) f32
    # x_ref: VMEM (Cin, t_hw)                       o_ref: VMEM (Cout, t_hw)
    acc = jnp.dot(w_ref[...], x_ref[...], preferred_element_type=jnp.float32)
    o_ref[...] = (acc + b_ref[...]).astype(o_ref.dtype)


def _out_conv_mxu(x_nchw, w2, bias, vmem_cap):
    N, Cin, H, W = x_nchw.shape
    Cout = w2.shape[0]
    HW = H * W
    dtype = x_nchw.dtype
    itemsize = jnp.dtype(dtype).itemsize

    budget = _step_byte_budget(vmem_cap)
    cin_p, cout_p = _round_up(Cin, 8), _round_up(Cout, 8)      # sublane-rounded
    t_hw = budget // max(1, (cin_p + cout_p) * itemsize)
    t_hw = max(_LANE, (t_hw // _LANE) * _LANE)
    if t_hw >= HW:
        t_hw = HW
    # Keep >= 4 grid steps (both v7x TensorCores busy) when splitting is useful.
    while (N * pl.cdiv(HW, t_hw) < 4 and t_hw > _LANE
           and t_hw * (cin_p + cout_p) * itemsize > (1 << 20)):
        t_hw = max(_LANE, (t_hw // 2 // _LANE) * _LANE)

    x3 = x_nchw.reshape(N, Cin, HW)           # free view, spatial on lane axis
    grid = (N, pl.cdiv(HW, t_hw))

    x_spec = pl.BlockSpec((None, Cin, t_hw), lambda n, j: (n, 0, j))
    o_spec = pl.BlockSpec((None, Cout, t_hw), lambda n, j: (n, 0, j))
    w_spec = pl.BlockSpec((Cout, Cin), lambda n, j: (0, 0))
    b_spec = pl.BlockSpec((Cout, 1), lambda n, j: (0, 0))

    # TODO(synk): for very large Cin/Cout add a trailing "arbitrary" K grid
    # axis with an f32 VMEM accumulator (pl.when init/finalize) and pad Cout to
    # the MXU tile so per-step VMEM stays bounded on v7x's 64 MiB.
    block_bytes = ((cin_p + cout_p) * t_hw * itemsize
                   + cout_p * _round_up(Cin, _LANE) * itemsize
                   + cout_p * _LANE * 4)
    vmem_limit = 2 * block_bytes + (4 << 20)
    vmem_limit = int(min(max(vmem_limit, 16 << 20),
                         max(32 << 20, vmem_cap - (8 << 20))))

    cost = pl.CostEstimate(
        flops=2 * N * HW * Cin * Cout,
        transcendentals=0,
        bytes_accessed=(N * Cin * HW + N * Cout * HW) * itemsize
                       + Cin * Cout * itemsize + Cout * 4,
    )

    out3 = pl.pallas_call(
        _mxu_kernel,
        out_shape=jax.ShapeDtypeStruct((N, Cout, HW), dtype),
        grid=grid,
        in_specs=[w_spec, b_spec, x_spec],
        out_specs=o_spec,
        compiler_params=pltpu.CompilerParams(
            dimension_semantics=("parallel", "parallel"),
            vmem_limit_bytes=vmem_limit,
        ),
        cost_estimate=cost,
    )(w2.astype(dtype), bias.astype(jnp.float32).reshape(Cout, 1), x3)

    return out3.reshape(N, Cout, H, W)


# ----------------------------------------------------------------------------
# Public entry point: equivalent of nn.Conv2d(C_in, C_out, kernel_size=1)(x).
# ----------------------------------------------------------------------------
def out_conv_1x1(x_nchw, weight, bias):
    """x_nchw: (N, Cin, H, W); weight: (Cout, Cin, 1, 1); bias: (Cout,)."""
    N, Cin, H, W = x_nchw.shape
    Cout = weight.shape[0]
    w2 = weight.reshape(Cout, Cin)            # free view, no transpose
    vmem_cap = _vmem_capacity_bytes()

    # Roofline-based crossover: VPU path while its MAC count stays under the
    # HBM time; MXU (vector-extended slot, has slack) beyond that.
    use_vpu = (Cin * Cout <= _crossover_factor() * (Cin + Cout)
               and Cin <= 256 and Cout <= 256)
    if use_vpu:
        return _out_conv_vpu(x_nchw, w2, bias, vmem_cap)
    return _out_conv_mxu(x_nchw, w2, bias, vmem_cap)


if __name__ == "__main__":
    key = jax.random.PRNGKey(0)
    k_x, k_w, k_b = jax.random.split(key, 3)

    # Primary shape (typical OutConv usage): batch=2, Cin=4, Cout=3, 16x16.
    N, Cin, Cout, Hs, Ws = 2, 4, 3, 16, 16
    x = jax.random.normal(k_x, (N, Cin, Hs, Ws), dtype=jnp.float32)
    weight = jax.random.normal(k_w, (Cout, Cin, 1, 1), dtype=jnp.float32) * 0.1
    bias = jax.random.normal(k_b, (Cout,), dtype=jnp.float32) * 0.1

    out = jax.block_until_ready(jax.jit(out_conv_1x1)(x, weight, bias))
    ref = (jnp.einsum("nchw,oc->nohw", x, weight.reshape(Cout, Cin))
           + bias[None, :, None, None])
    assert out.shape == (N, Cout, Hs, Ws)
    assert jnp.allclose(out, ref, atol=1e-5, rtol=1e-5)

    # HW not a multiple of 128 (exercises the padded / masked-edge handling).
    x2 = jax.random.normal(k_x, (1, Cin, 10, 10), dtype=jnp.float32)
    out2 = jax.block_until_ready(jax.jit(out_conv_1x1)(x2, weight, bias))
    ref2 = (jnp.einsum("nchw,oc->nohw", x2, weight.reshape(Cout, Cin))
            + bias[None, :, None, None])
    assert jnp.allclose(out2, ref2, atol=1e-5, rtol=1e-5)

    # Larger channel counts (exercises the MXU fallback path).
    Cin3, Cout3 = 32, 32
    x3 = jax.random.normal(k_x, (1, Cin3, 8, 16), dtype=jnp.float32)
    w3 = jax.random.normal(k_w, (Cout3, Cin3, 1, 1), dtype=jnp.float32) * 0.1
    b3 = jax.random.normal(k_b, (Cout3,), dtype=jnp.float32) * 0.1
    out3 = jax.block_until_ready(jax.jit(out_conv_1x1)(x3, w3, b3))
    ref3 = (jnp.einsum("nchw,oc->nohw", x3, w3.reshape(Cout3, Cin3))
            + b3[None, :, None, None])
    assert jnp.allclose(out3, ref3, atol=1e-4, rtol=1e-4)

    print("KERNEL_OK")
</pallas_src>

<mosaic_0001>
module attributes {stable_mosaic.version = 11 : i64} {
  func.func @_vpu_kernel(%arg0: i32, %arg1: i32, %arg2: memref<3x4xf32, #tpu.memory_space<smem>>, %arg3: memref<3xf32, #tpu.memory_space<smem>>, %arg4: memref<1x4x2x128xf32, #tpu.memory_space<vmem>>, %arg5: memref<1x3x2x128xf32, #tpu.memory_space<vmem>>) attributes {dimension_semantics = [#tpu.dimension_semantics<parallel>, #tpu.dimension_semantics<parallel>], iteration_bounds = array<i64: 2, 1>, scalar_prefetch = 0 : i64, scratch_operands = 0 : i64, tpu.core_type = #tpu.core_type<tc>, window_params = [{transform_indices = @transform_0, window_bounds = array<i64: 3, 4>}, {transform_indices = @transform_1, window_bounds = array<i64: 3>}, {transform_indices = @transform_2, window_bounds = array<i64: 1, 4, 2, 128>}, {transform_indices = @transform_3, window_bounds = array<i64: 1, 3, 2, 128>}]} {
    %c0 = arith.constant 0 : index
    %c0_0 = arith.constant 0 : index
    %c0_1 = arith.constant 0 : index
    %c0_2 = arith.constant 0 : index
    %0 = vector.load %arg4[%c0, %c0_0, %c0_1, %c0_2] : memref<1x4x2x128xf32, #tpu.memory_space<vmem>>, vector<1x1x2x128xf32>
    %1 = vector.shape_cast %0 : vector<1x1x2x128xf32> to vector<2x128xf32>
    %c0_3 = arith.constant 0 : index
    %c0_4 = arith.constant 0 : index
    %2 = memref.load %arg2[%c0_3, %c0_4] : memref<3x4xf32, #tpu.memory_space<smem>>
    %3 = vector.broadcast %2 : f32 to vector<2x128xf32>
    %4 = arith.mulf %1, %3 : vector<2x128xf32>
    %c0_5 = arith.constant 0 : index
    %c1 = arith.constant 1 : index
    %c0_6 = arith.constant 0 : index
    %c0_7 = arith.constant 0 : index
    %5 = vector.load %arg4[%c0_5, %c1, %c0_6, %c0_7] : memref<1x4x2x128xf32, #tpu.memory_space<vmem>>, vector<1x1x2x128xf32>
    %6 = vector.shape_cast %5 : vector<1x1x2x128xf32> to vector<2x128xf32>
    %c0_8 = arith.constant 0 : index
    %c1_9 = arith.constant 1 : index
    %7 = memref.load %arg2[%c0_8, %c1_9] : memref<3x4xf32, #tpu.memory_space<smem>>
    %8 = vector.broadcast %7 : f32 to vector<2x128xf32>
    %9 = arith.mulf %6, %8 : vector<2x128xf32>
    %10 = arith.addf %4, %9 : vector<2x128xf32>
    %c0_10 = arith.constant 0 : index
    %c2 = arith.constant 2 : index
    %c0_11 = arith.constant 0 : index
    %c0_12 = arith.constant 0 : index
    %11 = vector.load %arg4[%c0_10, %c2, %c0_11, %c0_12] : memref<1x4x2x128xf32, #tpu.memory_space<vmem>>, vector<1x1x2x128xf32>
    %12 = vector.shape_cast %11 : vector<1x1x2x128xf32> to vector<2x128xf32>
    %c0_13 = arith.constant 0 : index
    %c2_14 = arith.constant 2 : index
    %13 = memref.load %arg2[%c0_13, %c2_14] : memref<3x4xf32, #tpu.memory_space<smem>>
    %14 = vector.broadcast %13 : f32 to vector<2x128xf32>
    %15 = arith.mulf %12, %14 : vector<2x128xf32>
    %16 = arith.addf %10, %15 : vector<2x128xf32>
    %c0_15 = arith.constant 0 : index
    %c3 = arith.constant 3 : index
    %c0_16 = arith.constant 0 : index
    %c0_17 = arith.constant 0 : index
    %17 = vector.load %arg4[%c0_15, %c3, %c0_16, %c0_17] : memref<1x4x2x128xf32, #tpu.memory_space<vmem>>, vector<1x1x2x128xf32>
    %18 = vector.shape_cast %17 : vector<1x1x2x128xf32> to vector<2x128xf32>
    %c0_18 = arith.constant 0 : index
    %c3_19 = arith.constant 3 : index
    %19 = memref.load %arg2[%c0_18, %c3_19] : memref<3x4xf32, #tpu.memory_space<smem>>
    %20 = vector.broadcast %19 : f32 to vector<2x128xf32>
    %21 = arith.mulf %18, %20 : vector<2x128xf32>
    %22 = arith.addf %16, %21 : vector<2x128xf32>
    %c0_20 = arith.constant 0 : index
    %23 = memref.load %arg3[%c0_20] : memref<3xf32, #tpu.memory_space<smem>>
    %24 = vector.broadcast %23 : f32 to vector<2x128xf32>
    %25 = arith.addf %22, %24 : vector<2x128xf32>
    %c0_21 = arith.constant 0 : index
    %c0_22 = arith.constant 0 : index
    %c0_23 = arith.constant 0 : index
    %c0_24 = arith.constant 0 : index
    %26 = vector.load %arg5[%c0_21, %c0_22, %c0_23, %c0_24] : memref<1x3x2x128xf32, #tpu.memory_space<vmem>>, vector<1x1x2x128xf32>
    %27 = vector.shape_cast %26 : vector<1x1x2x128xf32> to vector<2x128xf32>
    %28 = vector.shape_cast %25 : vector<2x128xf32> to vector<1x1x2x128xf32>
    tpu.vector_store %arg5[%c0_21, %c0_22, %c0_23, %c0_24], %28 {strides = array<i32>} : memref<1x3x2x128xf32, #tpu.memory_space<vmem>>, vector<1x1x2x128xf32>,
    %c0_25 = arith.constant 0 : index
    %c0_26 = arith.constant 0 : index
    %c0_27 = arith.constant 0 : index
    %c0_28 = arith.constant 0 : index
    %29 = vector.load %arg4[%c0_25, %c0_26, %c0_27, %c0_28] : memref<1x4x2x128xf32, #tpu.memory_space<vmem>>, vector<1x1x2x128xf32>
    %30 = vector.shape_cast %29 : vector<1x1x2x128xf32> to vector<2x128xf32>
    %c1_29 = arith.constant 1 : index
    %c0_30 = arith.constant 0 : index
    %31 = memref.load %arg2[%c1_29, %c0_30] : memref<3x4xf32, #tpu.memory_space<smem>>
    %32 = vector.broadcast %31 : f32 to vector<2x128xf32>
    %33 = arith.mulf %30, %32 : vector<2x128xf32>
    %c0_31 = arith.constant 0 : index
    %c1_32 = arith.constant 1 : index
    %c0_33 = arith.constant 0 : index
    %c0_34 = arith.constant 0 : index
    %34 = vector.load %arg4[%c0_31, %c1_32, %c0_33, %c0_34] : memref<1x4x2x128xf32, #tpu.memory_space<vmem>>, vector<1x1x2x128xf32>
    %35 = vector.shape_cast %34 : vector<1x1x2x128xf32> to vector<2x128xf32>
    %c1_35 = arith.constant 1 : index
    %c1_36 = arith.constant 1 : index
    %36 = memref.load %arg2[%c1_35, %c1_36] : memref<3x4xf32, #tpu.memory_space<smem>>
    %37 = vector.broadcast %36 : f32 to vector<2x128xf32>
    %38 = arith.mulf %35, %37 : vector<2x128xf32>
    %39 = arith.addf %33, %38 : vector<2x128xf32>
    %c0_37 = arith.constant 0 : index
    %c2_38 = arith.constant 2 : index
    %c0_39 = arith.constant 0 : index
    %c0_40 = arith.constant 0 : index
    %40 = vector.load %arg4[%c0_37, %c2_38, %c0_39, %c0_40] : memref<1x4x2x128xf32, #tpu.memory_space<vmem>>, vector<1x1x2x128xf32>
    %41 = vector.shape_cast %40 : vector<1x1x2x128xf32> to vector<2x128xf32>
    %c1_41 = arith.constant 1 : index
    %c2_42 = arith.constant 2 : index
    %42 = memref.load %arg2[%c1_41, %c2_42] : memref<3x4xf32, #tpu.memory_space<smem>>
    %43 = vector.broadcast %42 : f32 to vector<2x128xf32>
    %44 = arith.mulf %41, %43 : vector<2x128xf32>
    %45 = arith.addf %39, %44 : vector<2x128xf32>
    %c0_43 = arith.constant 0 : index
    %c3_44 = arith.constant 3 : index
    %c0_45 = arith.constant 0 : index
    %c0_46 = arith.constant 0 : index
    %46 = vector.load %arg4[%c0_43, %c3_44, %c0_45, %c0_46] : memref<1x4x2x128xf32, #tpu.memory_space<vmem>>, vector<1x1x2x128xf32>
    %47 = vector.shape_cast %46 : vector<1x1x2x128xf32> to vector<2x128xf32>
    %c1_47 = arith.constant 1 : index
    %c3_48 = arith.constant 3 : index
    %48 = memref.load %arg2[%c1_47, %c3_48] : memref<3x4xf32, #tpu.memory_space<smem>>
    %49 = vector.broadcast %48 : f32 to vector<2x128xf32>
    %50 = arith.mulf %47, %49 : vector<2x128xf32>
    %51 = arith.addf %45, %50 : vector<2x128xf32>
    %c1_49 = arith.constant 1 : index
    %52 = memref.load %arg3[%c1_49] : memref<3xf32, #tpu.memory_space<smem>>
    %53 = vector.broadcast %52 : f32 to vector<2x128xf32>
    %54 = arith.addf %51, %53 : vector<2x128xf32>
    %c0_50 = arith.constant 0 : index
    %c1_51 = arith.constant 1 : index
    %c0_52 = arith.constant 0 : index
    %c0_53 = arith.constant 0 : index
    %55 = vector.load %arg5[%c0_50, %c1_51, %c0_52, %c0_53] : memref<1x3x2x128xf32, #tpu.memory_space<vmem>>, vector<1x1x2x128xf32>
    %56 = vector.shape_cast %55 : vector<1x1x2x128xf32> to vector<2x128xf32>
    %57 = vector.shape_cast %54 : vector<2x128xf32> to vector<1x1x2x128xf32>
    tpu.vector_store %arg5[%c0_50, %c1_51, %c0_52, %c0_53], %57 {strides = array<i32>} : memref<1x3x2x128xf32, #tpu.memory_space<vmem>>, vector<1x1x2x128xf32>,
    %c0_54 = arith.constant 0 : index
    %c0_55 = arith.constant 0 : index
    %c0_56 = arith.constant 0 : index
    %c0_57 = arith.constant 0 : index
    %58 = vector.load %arg4[%c0_54, %c0_55, %c0_56, %c0_57] : memref<1x4x2x128xf32, #tpu.memory_space<vmem>>, vector<1x1x2x128xf32>
    %59 = vector.shape_cast %58 : vector<1x1x2x128xf32> to vector<2x128xf32>
    %c2_58 = arith.constant 2 : index
    %c0_59 = arith.constant 0 : index
    %60 = memref.load %arg2[%c2_58, %c0_59] : memref<3x4xf32, #tpu.memory_space<smem>>
    %61 = vector.broadcast %60 : f32 to vector<2x128xf32>
    %62 = arith.mulf %59, %61 : vector<2x128xf32>
    %c0_60 = arith.constant 0 : index
    %c1_61 = arith.constant 1 : index
    %c0_62 = arith.constant 0 : index
    %c0_63 = arith.constant 0 : index
    %63 = vector.load %arg4[%c0_60, %c1_61, %c0_62, %c0_63] : memref<1x4x2x128xf32, #tpu.memory_space<vmem>>, vector<1x1x2x128xf32>
    %64 = vector.shape_cast %63 : vector<1x1x2x128xf32> to vector<2x128xf32>
    %c2_64 = arith.constant 2 : index
    %c1_65 = arith.constant 1 : index
    %65 = memref.load %arg2[%c2_64, %c1_65] : memref<3x4xf32, #tpu.memory_space<smem>>
    %66 = vector.broadcast %65 : f32 to vector<2x128xf32>
    %67 = arith.mulf %64, %66 : vector<2x128xf32>
    %68 = arith.addf %62, %67 : vector<2x128xf32>
    %c0_66 = arith.constant 0 : index
    %c2_67 = arith.constant 2 : index
    %c0_68 = arith.constant 0 : index
    %c0_69 = arith.constant 0 : index
    %69 = vector.load %arg4[%c0_66, %c2_67, %c0_68, %c0_69] : memref<1x4x2x128xf32, #tpu.memory_space<vmem>>, vector<1x1x2x128xf32>
    %70 = vector.shape_cast %69 : vector<1x1x2x128xf32> to vector<2x128xf32>
    %c2_70 = arith.constant 2 : index
    %c2_71 = arith.constant 2 : index
    %71 = memref.load %arg2[%c2_70, %c2_71] : memref<3x4xf32, #tpu.memory_space<smem>>
    %72 = vector.broadcast %71 : f32 to vector<2x128xf32>
    %73 = arith.mulf %70, %72 : vector<2x128xf32>
    %74 = arith.addf %68, %73 : vector<2x128xf32>
    %c0_72 = arith.constant 0 : index
    %c3_73 = arith.constant 3 : index
    %c0_74 = arith.constant 0 : index
    %c0_75 = arith.constant 0 : index
    %75 = vector.load %arg4[%c0_72, %c3_73, %c0_74, %c0_75] : memref<1x4x2x128xf32, #tpu.memory_space<vmem>>, vector<1x1x2x128xf32>
    %76 = vector.shape_cast %75 : vector<1x1x2x128xf32> to vector<2x128xf32>
    %c2_76 = arith.constant 2 : index
    %c3_77 = arith.constant 3 : index
    %77 = memref.load %arg2[%c2_76, %c3_77] : memref<3x4xf32, #tpu.memory_space<smem>>
    %78 = vector.broadcast %77 : f32 to vector<2x128xf32>
    %79 = arith.mulf %76, %78 : vector<2x128xf32>
    %80 = arith.addf %74, %79 : vector<2x128xf32>
    %c2_78 = arith.constant 2 : index
    %81 = memref.load %arg3[%c2_78] : memref<3xf32, #tpu.memory_space<smem>>
    %82 = vector.broadcast %81 : f32 to vector<2x128xf32>
    %83 = arith.addf %80, %82 : vector<2x128xf32>
    %c0_79 = arith.constant 0 : index
    %c2_80 = arith.constant 2 : index
    %c0_81 = arith.constant 0 : index
    %c0_82 = arith.constant 0 : index
    %84 = vector.load %arg5[%c0_79, %c2_80, %c0_81, %c0_82] : memref<1x3x2x128xf32, #tpu.memory_space<vmem>>, vector<1x1x2x128xf32>
    %85 = vector.shape_cast %84 : vector<1x1x2x128xf32> to vector<2x128xf32>
    %86 = vector.shape_cast %83 : vector<2x128xf32> to vector<1x1x2x128xf32>
    tpu.vector_store %arg5[%c0_79, %c2_80, %c0_81, %c0_82], %86 {strides = array<i32>} : memref<1x3x2x128xf32, #tpu.memory_space<vmem>>, vector<1x1x2x128xf32>,
    return
  }
  func.func @transform_0(%arg0: i32, %arg1: i32) -> (i32, i32) {
    %c0_i32 = arith.constant 0 : i32
    %c0_i32_0 = arith.constant 0 : i32
    %c0_i32_1 = arith.constant 0 : i32
    return %c0_i32, %c0_i32_0 : i32, i32
  }
  func.func @transform_1(%arg0: i32, %arg1: i32) -> i32 {
    %c0_i32 = arith.constant 0 : i32
    %c0_i32_0 = arith.constant 0 : i32
    return %c0_i32 : i32
  }
  func.func @transform_2(%arg0: i32, %arg1: i32) -> (i32, i32, i32, i32) {
    %c0_i32 = arith.constant 0 : i32
    %c0_i32_0 = arith.constant 0 : i32
    %c0_i32_1 = arith.constant 0 : i32
    return %arg0, %c0_i32, %arg1, %c0_i32_0 : i32, i32, i32, i32
  }
  func.func @transform_3(%arg0: i32, %arg1: i32) -> (i32, i32, i32, i32) {
    %c0_i32 = arith.constant 0 : i32
    %c0_i32_0 = arith.constant 0 : i32
    %c0_i32_1 = arith.constant 0 : i32
    return %arg0, %c0_i32, %arg1, %c0_i32_0 : i32, i32, i32, i32
  }
}

</mosaic_0001>

<bundles_post_ra>
// kernel: out_conv_1x1.1
= control target key start
LH: loop header
LB: loop body
LE: loop exit
PB: predicated region body
PF: predicated region fallthrough
CT: control target
= control target key end

     0   :  { %8 = vsyncpa [#allocation3], 0  ;;  %s678_s0 = inlined_call_operand.vmem [shape: f32[3,4], index: 0, kind: input, shape index: {}]   ;;  %s679_s1 = inlined_call_operand.vmem [shape: f32[3], index: 1, kind: input, shape index: {}]   ;;  %s680_s2 = inlined_call_operand.vmem [shape: f32[2,4,2,128], index: 2, kind: input, shape index: {}]   ;;  %s681_s3 = inlined_call_operand.vmem [shape: f32[2,3,2,128], index: 3, kind: output, shape index: {}]  }
   0x1   :  { %9 = vsyncpa [#allocation5], 0  ;;  %s578_s12 = smov 0   ;;  %s580_s13 = smov 0  }
   0x2   :  { %s582_s14 = smov 0  }
   0x3 LB: > { %s409_s15 = sadd.s32 4294967295, %s554_s14   ;;  %s27_s16 = sadd.s32 1, %s550_s13  ;;  %s554_s14 = sphi %s582_s14, %s15_s14   ;;  %s550_s13 = sphi %s580_s13, %s691_s13   ;;  %s546_s12 = sphi %s578_s12, %s690_s12  }
   0x4   : > { %p29_p0 = scmp.ge.s32.totalorder %s27_s16, 2  ;;  %p411_p1 = scmp.ge.s32.totalorder %s554_s14, 1 }
   0x5   : > { %p130_p2 = scmp.lt.s32.totalorder %s554_s14, 3  ;;  %p603_p4 = scmp.eq.s32.totalorder %s409_s15, 0 }
   0x6   : > { %s693_s16 = smov (%p29_p0, %s27_s16), 0  ;;  %s143_s21 = sshll.u32 %s678_s0, 4  ;;  %s144_s21 = int_to_ptr.vmem [resolvable:$true] %s143_s21 }
   0x7   : > { %p599_p3 = pnand %p411_p1, %p130_p2  ;;  %s154_s24 = sshll.u32 %s679_s1, 4  ;;  %s155_s24 = int_to_ptr.vmem [resolvable:$true] %s154_s24 }
   0x8   : > { %s686_s18 = scalar_select %p603_p4, 1, 0 }
   0x9   : > { %s685_s17 = scalar_select %p599_p3, 1, 0 }
   0xa   : > { %p457_p5 = pneg %p599_p3  ;;  %s494_s26 = scalar_lea.vmem %s144_s21, 64 }
   0xb   : > { %p495_p7 = scmp.ne.s32.totalorder %s144_s21, %s494_s26  ;;  %p502_p11 = scmp.lt.s32.totalorder %s144_s21, %s144_s21 }
   0xc   : > { %p617_p6 = pnand %p603_p4, %p457_p5  ;;  %p503_p12 = scmp.lt.s32.totalorder %s494_s26, %s494_s26 }
   0xe   : > { %p496_p8 = pneg %p617_p6  ;;  %p504_p13 = por %p503_p12, %p502_p11 }
  0x10   : > { %p497_p9 = pnand %p496_p8, %p495_p7 }
  0x12   : > { %p498_p10 = pneg %p497_p9 }
  0x14   : > { %p505_p0 = pnand %p504_p13, %p498_p10 }
  0x16   : > { %508 = shalt.err (!%p505_p0)
}
  0x17   : > { %s556_s27 = smov [#allocation2]   ;;  %s509_s28 = scalar_lea.vmem %s155_s24, 16 }
  0x18   : > { %460 = dma.vmem_to_smem (!%p617_p6), %s144_s21, 64, %s556_s27, [#allocation3]  }
  0x19   : > { %p510_p1 = scmp.ne.s32.totalorder %s155_s24, %s509_s28  ;;  %p517_p4 = scmp.lt.s32.totalorder %s155_s24, %s155_s24 }
  0x1a   : > { %p518_p3 = scmp.lt.s32.totalorder %s509_s28, %s509_s28 }
  0x1b   : > { %p512_p2 = pnand %p510_p1, %p496_p8 }
  0x1c   : > { %p519_p7 = por %p518_p3, %p517_p4 }
  0x1d   : > { %p513_p5 = pneg %p512_p2 }
  0x1f   : > { %p520_p9 = pnand %p519_p7, %p513_p5 }
  0x21   : > { %523 = shalt.err (!%p520_p9)
}
  0x22   : > { %s557_s29 = smov [#allocation4]   ;;  %p688_p10 = scmp.ne.s32.totalorder %s685_s17, 0 }
  0x23   : > { %463 = dma.vmem_to_smem (!%p617_p6), %s155_s24, 16, %s557_s29, [#allocation5]  }
  0x24   : > { %178 = sbr.rel (%p688_p10) target bundleno = 75 (0x4b), region = 32  ;;  %p689_p11 = scmp.ne.s32.totalorder (!%p688_p10), %s686_s18, 0 }
  0x2b   : > { %537 = dma.done.wait (%p689_p11), [#allocation3], 64  }
  0x2c   : > { %539 = vsyncadd (%p689_p11), [#allocation3], 4294967232 }
  0x2d   : > { %541 = dma.done.wait (%p689_p11), [#allocation5], 16  }
  0x2e   : > { %543 = vsyncadd (%p689_p11), [#allocation5], 4294967280 }
  0x2f   : > { %188 = sfence }
  0x30   : > { %p213_p3 = scmp.lt.s32.totalorder %s546_s12, 1  ;;  %s230_s30 = sld [smem:[#allocation2]] }
  0x31   : > { %s422_s4 = sld [smem:[#allocation2 + $0x1]]  ;;  %s424_s5 = sld [smem:[#allocation2 + $0x2]] }
  0x32   : > { %s695_s12 = smov (!%p213_p3, %s546_s12), 1  ;;  %s426_s6 = sld [smem:[#allocation2 + $0x3]] }
  0x33   : > { %s447_s7 = sshll.u32 %s695_s12, 3  ;;  %s642_s8 = sld [smem:[#allocation4]] }
  0x34   : > { %s647_s11 = scalar_lea.vmem %s680_s2, %s447_s7  ;;  %s427_s15 = sld [smem:[#allocation2 + $0x80]] }
  0x35   : > { %v229_v0 = vld [vmem:[%s647_s11] sm:$0x3]  ;;  %v421_v2 = vld [vmem:[%s647_s11 + $0x2] sm:$0x3]  ;;  %v423_v3 = vld [vmem:[%s647_s11 + $0x4] sm:$0x3] }
  0x36   : > { %v231_v1 = vstv %s230_s30  ;;  %v425_v7 = vld [vmem:[%s647_s11 + $0x6] sm:$0x3]  ;;  %s429_s17 = sld [smem:[#allocation2 + $0x81]]  ;;  %s431_s18 = sld [smem:[#allocation2 + $0x82]]  ;;  %v255_v11 = vld [vmem:[%s647_s11] sm:$0x3] }
  0x37   : > { %v232_v4 = vmul.f32 %v231_v1, %v229_v0  ;;  %v236_v5 = vstv %s422_s4  ;;  %v242_v6 = vstv %s424_s5  ;;  %s448_s19 = smul.u32 6, %s695_s12  ;;  %s433_s20 = sld [smem:[#allocation2 + $0x83]]  ;;  %v428_v15 = vld [vmem:[%s647_s11 + $0x2] sm:$0x3]  ;;  %v430_v18 = vld [vmem:[%s647_s11 + $0x4] sm:$0x3] }
  0x38   : > { %v237_v8 = vmul.f32 %v421_v2, %v236_v5  ;;  %v243_v9 = vmul.f32 %v423_v3, %v242_v6  ;;  %v248_v10 = vstv %s426_s6  ;;  %s655_s21 = sld [smem:[#allocation4 + $0x1]]  ;;  %s436_s22 = sld [smem:[#allocation2 + $0x100]]  ;;  %v432_v21 = vld [vmem:[%s647_s11 + $0x6] sm:$0x3]  ;;  %v279_v25 = vld [vmem:[%s647_s11] sm:$0x3] }
  0x39   : > { %v249_v13 = vmul.f32 %v425_v7, %v248_v10  ;;  %s438_s23 = sld [smem:[#allocation2 + $0x101]]  ;;  %s440_s24 = sld [smem:[#allocation2 + $0x102]]  ;;  %v252_v19 = vstv %s642_s8  ;;  %v437_v28 = vld [vmem:[%s647_s11 + $0x2] sm:$0x3]  ;;  %v439_v29 = vld [vmem:[%s647_s11 + $0x4] sm:$0x3] }
  0x3a   : > { %v238_v12 = vadd.f32 %v237_v8, %v232_v4  ;;  %v257_v14 = vstv %s427_s15  ;;  %s442_s12 = sld [smem:[#allocation2 + $0x103]]  ;;  %s228_s27 = scalar_lea.vmem %s681_s3, %s448_s19  ;;  %v441_v37 = vld [vmem:[%s647_s11 + $0x6] sm:$0x3] }
  0x3b   : > { %v258_v17 = vmul.f32 %v257_v14, %v255_v11  ;;  %s443_s28 = sld [smem:[#allocation4 + $0x2]] }
  0x3c   : > { %v244_v16 = vadd.f32 %v243_v9, %v238_v12  ;;  %v261_v20 = vstv %s429_s17  ;;  %v266_v24 = vstv %s431_s18 }
  0x3d   : > { %v262_v23 = vmul.f32 %v428_v15, %v261_v20  ;;  %v267_v26 = vmul.f32 %v430_v18, %v266_v24  ;;  %v271_v27 = vstv %s433_s20 }
  0x3e   : > { %v250_v22 = vadd.f32 %v249_v13, %v244_v16  ;;  %v272_v32 = vmul.f32 %v432_v21, %v271_v27  ;;  %v281_v33 = vstv %s436_s22  ;;  %v275_v42 = vstv %s655_s21 }
  0x3f   : > { %v263_v31 = vadd.f32 %v262_v23, %v258_v17  ;;  %v282_v34 = vmul.f32 %v281_v33, %v279_v25  ;;  %v285_v35 = vstv %s438_s23  ;;  %v290_v36 = vstv %s440_s24 }
  0x40   : > { %v253_v30 = vadd.f32 %v252_v19, %v250_v22  ;;  %v286_v39 = vmul.f32 %v437_v28, %v285_v35  ;;  %v291_v40 = vmul.f32 %v439_v29, %v290_v36  ;;  %v295_v41 = vstv %s442_s12 }
  0x41   : > { %v268_v38 = vadd.f32 %v267_v26, %v263_v31  ;;  %v296_v45 = vmul.f32 %v441_v37, %v295_v41  ;;  %v299_v48 = vstv %s443_s28 }
  0x42   : > { %254 = vst [vmem:[%s228_s27] sm:$0x3] %v253_v30  ;;  %v287_v44 = vadd.f32 %v286_v39, %v282_v34 }
  0x43   : > { %v273_v43 = vadd.f32 %v272_v32, %v268_v38 }
  0x44   : > { %v292_v47 = vadd.f32 %v291_v40, %v287_v44 }
  0x45   : > { %v276_v46 = vadd.f32 %v275_v42, %v273_v43 }
  0x46   : > { %v297_v49 = vadd.f32 %v296_v45, %v292_v47 }
  0x47   : > { %435 = vst [vmem:[%s228_s27 + $0x2] sm:$0x3] %v276_v46 }
  0x48   : > { %v300_v50 = vadd.f32 %v299_v48, %v297_v49 }
  0x4a   : > { %444 = vst [vmem:[%s228_s27 + $0x4] sm:$0x3] %v300_v50 }
  0x4b PF: > { %s15_s14 = sadd.s32 1, %s554_s14   ;;  %s690_s12 = smov %s550_s13 }
  0x4c   : > { %p12_p4 = scmp.ge.s32.totalorder %s15_s14, 4   ;;  %s691_s13 = smov %s693_s16 }
  0x4e   :  { %14 = sbr.rel (!%p12_p4) target bundleno = 3 (0x3), region = 76 }
  0x55   :  { %330 = vsyncpa [#allocation3], 1 }
  0x56   :  { %332 = vsyncpa [#allocation3 + $0x1], 1 }
  0x57   :  { %333 = vsyncpa [#allocation5], 1 }

</bundles_post_ra>
